<compile_context>
chip_gen: v7x
topology: tpu7x:2x2x1
jax: 0.10.0
libtpu: 0.0.40
codegen_flags: <defaults>
</compile_context>

<pallas_src>
import jax
import jax.numpy as jnp
from jax.experimental import pallas as pl
from jax.experimental.pallas import tpu as pltpu


def _round_up(x, m):
    return ((x + m - 1) // m) * m


def _tensorcores_per_chip():
    """Best-effort detection of v7x (2 TensorCores per chip)."""
    try:
        kind = jax.devices()[0].device_kind.lower()
        if "v7" in kind:
            return 2
    except Exception:
        pass
    return 1


def dqn_mlp_kernel(x_ref, w1_ref, w2_ref, w3_ref, b_ref, out_ref):
    """Fused 3-layer MLP: relu(x@W1+b1) -> relu(.@W2+b2) -> .@W3+b3."""
    hid = w1_ref.shape[1]            # 128
    n_act = w3_ref.shape[1]          # n_actions (unpadded)

    # In-kernel bf16 cast of the activations (no padded HBM copy, no extra
    # XLA cast launch); weights are already bf16.
    x = x_ref[...].astype(w1_ref.dtype)          # (TB, n_obs) bf16

    b1 = b_ref[0:1, :hid]                        # (1, 128)  f32
    b2 = b_ref[1:2, :hid]
    b3 = b_ref[2:3, :n_act]

    # MXU matmuls with bf16 inputs, f32 accumulation; f32 elementwise
    # epilogues (v5e VPU has no bf16).
    h1 = jnp.dot(x, w1_ref[...], preferred_element_type=jnp.float32)       # (TB, 128)
    h1 = jnp.maximum(h1 + b1, 0.0)

    h2 = jnp.dot(h1.astype(w2_ref.dtype), w2_ref[...],
                 preferred_element_type=jnp.float32)                       # (TB, 128)
    h2 = jnp.maximum(h2 + b2, 0.0)

    out = jnp.dot(h2.astype(w3_ref.dtype), w3_ref[...],
                  preferred_element_type=jnp.float32)                      # (TB, n_act)
    out_ref[...] = (out + b3).astype(out_ref.dtype)


def prepare_params(params, *, compute_dtype=jnp.bfloat16):
    """One-time parameter prep (hoisted out of the per-forward path).

    Casts weights to bf16 (MXU-native) and packs the three biases into a
    single (3, bias_w) f32 buffer so the kernel prologue issues one tiny DMA.
    """
    w1, b1, w2, b2, w3, b3 = params
    n_obs, hid = w1.shape
    n_actions = w3.shape[1]
    bias_w = max(hid, n_actions)

    w1p = w1.astype(compute_dtype)               # (n_obs, 128)
    w2p = w2.astype(compute_dtype)               # (128, 128)
    w3p = w3.astype(compute_dtype)               # (128, n_actions)
    bias = (jnp.zeros((3, bias_w), jnp.float32)
            .at[0, :hid].set(b1.reshape(-1))
            .at[1, :hid].set(b2.reshape(-1))
            .at[2, :n_actions].set(b3.reshape(-1)))
    return (w1p, w2p, w3p, bias)


def dqn_mlp_forward(x, prepared_params, *, max_tile_batch=4096):
    """Runs the fused MLP kernel. Returns (q_values, hidden) like the nn.Module."""
    w1p, w2p, w3p, bias = prepared_params
    batch, n_obs = x.shape
    hid = w1p.shape[1]               # 128
    n_actions = w3p.shape[1]
    bias_w = bias.shape[1]

    # ---- Batch tiling ----------------------------------------------------
    # * tile batch rounded to 8 (sublane alignment); at most a handful of
    #   padded rows (never "almost a full tile").
    # * >= 2 grid steps on v7x for batch >= 16 so both TensorCores get work;
    #   single tile on v5e/v6e for small batches (1 TC, avoid extra step).
    # * max_tile_batch=4096 keeps per-step VMEM (x/out double buffers plus
    #   the (TB,128) f32 intermediates) well under the 32 MiB scoped default
    #   on every generation (incl. v7x's 64 MiB physical VMEM) while
    #   amortizing the ~0.35 µs per-grid-step overhead.
    b8 = _round_up(max(batch, 1), 8)
    min_tiles = 2 if (_tensorcores_per_chip() >= 2 and b8 >= 16) else 1
    num_tiles = max(min_tiles, pl.cdiv(b8, max_tile_batch))
    tb = _round_up(pl.cdiv(b8, num_tiles), 8)
    b_p = tb * num_tiles
    grid = (num_tiles,)

    # Row-only padding of x (no lane padding); zero rows keep math exact and
    # the padded output rows are sliced away below.
    if b_p != batch:
        xp = jnp.zeros((b_p, n_obs), x.dtype).at[:batch, :].set(x)
    else:
        xp = x

    itemsize_w = jnp.dtype(w1p.dtype).itemsize
    flops = 2 * b_p * (n_obs * hid + hid * hid + hid * n_actions)
    bytes_accessed = (
        xp.size * jnp.dtype(xp.dtype).itemsize          # activations in
        + (w1p.size + w2p.size + w3p.size) * itemsize_w  # weights (resident, one DMA)
        + bias.size * 4                                  # packed biases
        + b_p * n_actions * 4                            # Q-values out
    )

    q_padded = pl.pallas_call(
        dqn_mlp_kernel,
        out_shape=jax.ShapeDtypeStruct((b_p, n_actions), jnp.float32),
        grid=grid,
        in_specs=[
            pl.BlockSpec((tb, n_obs), lambda i: (i, 0)),       # x: tiled over batch
            pl.BlockSpec((n_obs, hid), lambda i: (0, 0)),      # weights: VMEM-resident
            pl.BlockSpec((hid, hid), lambda i: (0, 0)),
            pl.BlockSpec((hid, n_actions), lambda i: (0, 0)),
            pl.BlockSpec((3, bias_w), lambda i: (0, 0)),       # packed biases
        ],
        out_specs=pl.BlockSpec((tb, n_actions), lambda i: (i, 0)),
        compiler_params=pltpu.CompilerParams(
            dimension_semantics=("parallel",)),                # megacore split on v7x
        cost_estimate=pl.CostEstimate(
            flops=flops, transcendentals=0, bytes_accessed=bytes_accessed),
    )(xp, w1p, w2p, w3p, bias)

    q = q_padded[:batch] if b_p != batch else q_padded

    # self.hidden is a constant (zeros(1,1), zeros(1,1)) in the reference
    # module; no compute, so it stays in plain JAX glue.
    # TODO(synk): hidden/prevHidden are stateful nn.Module attrs; modeled here
    # as the constant tuple the forward actually returns.
    hidden = (jnp.zeros((1, 1), jnp.float32), jnp.zeros((1, 1), jnp.float32))
    return q, hidden


def init_params(key, n_observations, n_actions, hidden=128):
    """Deterministic parameter init (PyTorch Linear-style uniform ranges)."""
    ks = jax.random.split(key, 6)

    def linear_init(kw, kb, fan_in, fan_out):
        bound = 1.0 / jnp.sqrt(jnp.float32(fan_in))
        # stored as (in, out) so the kernel does x @ W
        w = jax.random.uniform(kw, (fan_in, fan_out), jnp.float32, -bound, bound)
        b = jax.random.uniform(kb, (1, fan_out), jnp.float32, -bound, bound)
        return w, b

    w1, b1 = linear_init(ks[0], ks[1], n_observations, hidden)
    w2, b2 = linear_init(ks[2], ks[3], hidden, hidden)
    w3, b3 = linear_init(ks[4], ks[5], hidden, n_actions)
    return (w1, b1, w2, b2, w3, b3)


if __name__ == "__main__":
    key = jax.random.PRNGKey(0)
    n_observations, n_actions, batch = 8, 4, 2

    pkey, xkey = jax.random.split(key)
    params = init_params(pkey, n_observations, n_actions)
    x = jax.random.normal(xkey, (batch, n_observations), jnp.float32)

    prepared = prepare_params(params)          # one-time prep, hoisted out of forward
    q, hidden = dqn_mlp_forward(x, prepared)
    jax.block_until_ready(q)
    jax.block_until_ready(hidden)

    assert q.shape == (batch, n_actions)
    assert hidden[0].shape == (1, 1) and hidden[1].shape == (1, 1)

    w1, b1, w2, b2, w3, b3 = params
    bf = jnp.bfloat16

    # Reference 1: identical bf16-input / f32-accumulate numerics in plain JAX.
    h = jnp.maximum(jnp.dot(x.astype(bf), w1.astype(bf),
                            preferred_element_type=jnp.float32) + b1, 0.0)
    h = jnp.maximum(jnp.dot(h.astype(bf), w2.astype(bf),
                            preferred_element_type=jnp.float32) + b2, 0.0)
    q_bf16_ref = jnp.dot(h.astype(bf), w3.astype(bf),
                         preferred_element_type=jnp.float32) + b3
    assert jnp.allclose(q, q_bf16_ref, atol=1e-3, rtol=1e-3)

    # Reference 2: full-f32 PyTorch-equivalent math (looser tol: bf16 matmul inputs).
    h = jnp.maximum(x @ w1 + b1, 0.0)
    h = jnp.maximum(h @ w2 + b2, 0.0)
    q_f32_ref = h @ w3 + b3
    assert jnp.allclose(q, q_f32_ref, atol=3e-2, rtol=3e-2)

    # Also exercise a larger / ragged batch to cover the multi-tile grid path.
    xb = jax.random.normal(jax.random.PRNGKey(1), (1056, n_observations), jnp.float32)
    qb, _ = dqn_mlp_forward(xb, prepared)
    jax.block_until_ready(qb)
    hb = jnp.maximum(xb @ w1 + b1, 0.0)
    hb = jnp.maximum(hb @ w2 + b2, 0.0)
    assert qb.shape == (1056, n_actions)
    assert jnp.allclose(qb, hb @ w3 + b3, atol=3e-2, rtol=3e-2)

    print("KERNEL_OK")
</pallas_src>

<mosaic_0001>
module attributes {stable_mosaic.version = 11 : i64} {
  func.func @dqn_mlp_kernel(%arg0: i32, %arg1: memref<8x8xf32, #tpu.memory_space<vmem>>, %arg2: memref<8x128xbf16, #tpu.memory_space<vmem>>, %arg3: memref<128x128xbf16, #tpu.memory_space<vmem>>, %arg4: memref<128x4xbf16, #tpu.memory_space<vmem>>, %arg5: memref<3x128xf32, #tpu.memory_space<vmem>>, %arg6: memref<8x4xf32, #tpu.memory_space<vmem>>) attributes {dimension_semantics = [#tpu.dimension_semantics<parallel>], iteration_bounds = array<i64: 1>, scalar_prefetch = 0 : i64, scratch_operands = 0 : i64, tpu.core_type = #tpu.core_type<tc>, window_params = [{transform_indices = @transform_0, window_bounds = array<i64: 8, 8>}, {pipeline_mode = #tpu.pipeline_mode<synchronous>, transform_indices = @transform_1, window_bounds = array<i64: 8, 128>}, {pipeline_mode = #tpu.pipeline_mode<synchronous>, transform_indices = @transform_2, window_bounds = array<i64: 128, 128>}, {pipeline_mode = #tpu.pipeline_mode<synchronous>, transform_indices = @transform_3, window_bounds = array<i64: 128, 4>}, {pipeline_mode = #tpu.pipeline_mode<synchronous>, transform_indices = @transform_4, window_bounds = array<i64: 3, 128>}, {transform_indices = @transform_5, window_bounds = array<i64: 8, 4>}]} {
    %c0 = arith.constant 0 : index
    %c0_0 = arith.constant 0 : index
    %0 = vector.load %arg1[%c0, %c0_0] : memref<8x8xf32, #tpu.memory_space<vmem>>, vector<8x8xf32>
    %1 = arith.truncf %0 : vector<8x8xf32> to vector<8x8xbf16>
    %c0_1 = arith.constant 0 : index
    %c0_2 = arith.constant 0 : index
    %2 = vector.load %arg5[%c0_1, %c0_2] : memref<3x128xf32, #tpu.memory_space<vmem>>, vector<1x128xf32>
    %c1 = arith.constant 1 : index
    %c0_3 = arith.constant 0 : index
    %3 = vector.load %arg5[%c1, %c0_3] : memref<3x128xf32, #tpu.memory_space<vmem>>, vector<1x128xf32>
    %c2 = arith.constant 2 : index
    %c0_4 = arith.constant 0 : index
    %4 = vector.load %arg5[%c2, %c0_4] : memref<3x128xf32, #tpu.memory_space<vmem>>, vector<1x4xf32>
    %c0_5 = arith.constant 0 : index
    %c0_6 = arith.constant 0 : index
    %5 = vector.load %arg2[%c0_5, %c0_6] : memref<8x128xbf16, #tpu.memory_space<vmem>>, vector<8x128xbf16>
    %cst = arith.constant dense<0.000000e+00> : vector<8x128xf32>
    %6 = tpu.matmul %1, %5, %cst {dimension_numbers = #tpu.dot_dimension_numbers<[1], [0], [0], [1], [0, 0, 1, 1], [], []>} : vector<8x8xbf16>, vector<8x128xbf16>, vector<8x128xf32> -> vector<8x128xf32>
    %7 = vector.broadcast %2 : vector<1x128xf32> to vector<8x128xf32>
    %8 = arith.addf %6, %7 : vector<8x128xf32>
    %cst_7 = arith.constant 0.000000e+00 : f32
    %9 = vector.broadcast %cst_7 : f32 to vector<8x128xf32>
    %10 = arith.maximumf %8, %9 : vector<8x128xf32>
    %11 = arith.truncf %10 : vector<8x128xf32> to vector<8x128xbf16>
    %c0_8 = arith.constant 0 : index
    %c0_9 = arith.constant 0 : index
    %12 = vector.load %arg3[%c0_8, %c0_9] : memref<128x128xbf16, #tpu.memory_space<vmem>>, vector<128x128xbf16>
    %cst_10 = arith.constant dense<0.000000e+00> : vector<8x128xf32>
    %13 = tpu.matmul %11, %12, %cst_10 {dimension_numbers = #tpu.dot_dimension_numbers<[1], [0], [0], [1], [0, 0, 1, 1], [], []>} : vector<8x128xbf16>, vector<128x128xbf16>, vector<8x128xf32> -> vector<8x128xf32>
    %14 = vector.broadcast %3 : vector<1x128xf32> to vector<8x128xf32>
    %15 = arith.addf %13, %14 : vector<8x128xf32>
    %cst_11 = arith.constant 0.000000e+00 : f32
    %16 = vector.broadcast %cst_11 : f32 to vector<8x128xf32>
    %17 = arith.maximumf %15, %16 : vector<8x128xf32>
    %18 = arith.truncf %17 : vector<8x128xf32> to vector<8x128xbf16>
    %c0_12 = arith.constant 0 : index
    %c0_13 = arith.constant 0 : index
    %19 = vector.load %arg4[%c0_12, %c0_13] : memref<128x4xbf16, #tpu.memory_space<vmem>>, vector<128x4xbf16>
    %cst_14 = arith.constant dense<0.000000e+00> : vector<8x4xf32>
    %20 = tpu.matmul %18, %19, %cst_14 {dimension_numbers = #tpu.dot_dimension_numbers<[1], [0], [0], [1], [0, 0, 1, 1], [], []>} : vector<8x128xbf16>, vector<128x4xbf16>, vector<8x4xf32> -> vector<8x4xf32>
    %21 = vector.broadcast %4 : vector<1x4xf32> to vector<8x4xf32>
    %22 = arith.addf %20, %21 : vector<8x4xf32>
    %c0_15 = arith.constant 0 : index
    %c0_16 = arith.constant 0 : index
    %23 = vector.load %arg6[%c0_15, %c0_16] : memref<8x4xf32, #tpu.memory_space<vmem>>, vector<8x4xf32>
    tpu.vector_store %arg6[%c0_15, %c0_16], %22 {strides = array<i32>} : memref<8x4xf32, #tpu.memory_space<vmem>>, vector<8x4xf32>,
    return
  }
  func.func @transform_0(%arg0: i32) -> (i32, i32) {
    %c0_i32 = arith.constant 0 : i32
    %c0_i32_0 = arith.constant 0 : i32
    return %arg0, %c0_i32 : i32, i32
  }
  func.func @transform_1(%arg0: i32) -> (i32, i32) {
    %c0_i32 = arith.constant 0 : i32
    %c0_i32_0 = arith.constant 0 : i32
    %c0_i32_1 = arith.constant 0 : i32
    return %c0_i32, %c0_i32_0 : i32, i32
  }
  func.func @transform_2(%arg0: i32) -> (i32, i32) {
    %c0_i32 = arith.constant 0 : i32
    %c0_i32_0 = arith.constant 0 : i32
    %c0_i32_1 = arith.constant 0 : i32
    return %c0_i32, %c0_i32_0 : i32, i32
  }
  func.func @transform_3(%arg0: i32) -> (i32, i32) {
    %c0_i32 = arith.constant 0 : i32
    %c0_i32_0 = arith.constant 0 : i32
    %c0_i32_1 = arith.constant 0 : i32
    return %c0_i32, %c0_i32_0 : i32, i32
  }
  func.func @transform_4(%arg0: i32) -> (i32, i32) {
    %c0_i32 = arith.constant 0 : i32
    %c0_i32_0 = arith.constant 0 : i32
    %c0_i32_1 = arith.constant 0 : i32
    return %c0_i32, %c0_i32_0 : i32, i32
  }
  func.func @transform_5(%arg0: i32) -> (i32, i32) {
    %c0_i32 = arith.constant 0 : i32
    %c0_i32_0 = arith.constant 0 : i32
    return %arg0, %c0_i32 : i32, i32
  }
}

</mosaic_0001>

<bundles_post_ra>
// kernel: tpu_custom_call.1
= control target key start
LH: loop header
LB: loop body
LE: loop exit
PB: predicated region body
PF: predicated region fallthrough
CT: control target
= control target key end

     0   :  { %10 = vsyncpa [#allocation3], 0  ;;  %s447_s18 = smov [#allocation2]   ;;  %s578_s0 = inlined_call_operand.vmem [shape: f32[8,8], index: 0, kind: input, shape index: {}]   ;;  %s579_s1 = inlined_call_operand.hbm [shape: bf16[8,128], index: 1, kind: input, shape index: {}]   ;;  %s580_s2 = inlined_call_operand.vmem [shape: bf16[128,128], index: 2, kind: input, shape index: {}]   ;;  %s581_s3 = inlined_call_operand.vmem [shape: bf16[128,4], index: 3, kind: input, shape index: {}]   ;;  %s582_s4 = inlined_call_operand.vmem [shape: f32[3,128], index: 4, kind: input, shape index: {}]   ;;  %s583_s5 = inlined_call_operand.vmem [shape: f32[8,4], index: 5, kind: output, shape index: {}]  }
   0x1   :  { %s19_s19 = sshll.u32 %s447_s18, 4  ;;  %s423_s22 = scalar_lea.hbm %s579_s1, 64  ;;  %s20_s19 = int_to_ptr.vmem [resolvable:$true] %s19_s19 }
   0x2   :  { %p424_p0 = scmp.ne.s32.totalorder %s579_s1, %s423_s22  ;;  %p427_p1 = scmp.lt.u32.totalorder %s423_s22, %s579_s1 }
   0x4   :  { %p429_p2 = pnand %p427_p1, %p424_p0 }
   0x6   :  { %432 = shalt.err (!%p429_p2)
}
   0x7   :  { %s433_s27 = scalar_lea.vmem %s20_s19, 64  ;;  %p438_p4 = scmp.lt.s32.totalorder %s20_s19, %s20_s19 }
   0x8   :  { %p434_p3 = scmp.ne.s32.totalorder %s20_s19, %s433_s27  ;;  %p439_p5 = scmp.lt.s32.totalorder %s433_s27, %s433_s27 }
   0xa   :  { %p440_p6 = por %p439_p5, %p438_p4 }
   0xc   :  { %p441_p7 = pnand %p440_p6, %p434_p3 }
   0xe   :  { %444 = shalt.err (!%p441_p7)
}
   0xf   :  { %22 = dma.hbm_to_vmem [thread:$0]  %s579_s1, 64, %s20_s19, [#allocation3]  }
  0x10   :  { %445 = dma.done.wait [#allocation3], 64  }
  0x11   :  { %446 = vsyncadd [#allocation3], 4294967232  ;;  %v448_v0 = vmov 0.0   ;;  %vm449_vm0 = vmmov 0   ;;  %vm47_vm1 = vcmask 1043456   ;;  %v33_v2 = vld [vmem:[%s578_s0] sm:$0xff] }
  0x12   :  { %358 = vmatprep.subr.bf16.mxu0 %v448_v0  ;;  %360 = vmatprep.mubr.msk.bf16.mxu0 %vm449_vm0, %v448_v0  ;;  %v38_v1 = vld [vmem:[#allocation2] sm:$0xf]  ;;  %v34_v4 = vpack.c.bf16 %v33_v2, %v33_v2  ;;  %vm43_vm2 = vcmask 64512   ;;  %v408_v6 = vld [vmem:[%s580_s2 + $0x8] sm:$0xff]   ;;  %v409_v7 = vld [vmem:[%s580_s2 + $0x10] sm:$0xff]   ;;  %vm311_vm3 = vcmask 31744  }
  0x13   :  { %364 = vmatprep.subr.bf16.mxu1 %v448_v0  ;;  %380 = vmatprep.mubr.msk.bf16.mxu1 %vm449_vm0, %v448_v0  ;;  %v49_v3 = vsel %vm47_vm1, %v38_v1, 0  ;;  %v407_v5 = vld [vmem:[%s580_s2] sm:$0xff]   ;;  %v410_v8 = vld [vmem:[%s580_s2 + $0x18] sm:$0xff]   ;;  %v412_v10 = vld [vmem:[%s580_s2 + $0x28] sm:$0xff]  }
  0x14   :  { %359 = vmatpush3.bf16.msra.mxu0 %v49_v3  ;;  %365 = vmatpush3.bf16.msra.mxu1 %v407_v5  ;;  %v411_v9 = vld [vmem:[%s580_s2 + $0x20] sm:$0xff]   ;;  %v413_v11 = vld [vmem:[%s580_s2 + $0x30] sm:$0xff]   ;;  %v414_v12 = vld [vmem:[%s580_s2 + $0x38] sm:$0xff]  }
  0x15   :  { %384 = vmatprep.subr.bf16.mxu0 %v448_v0  ;;  %366 = vmatprep.subr.bf16.mxu1 %v448_v0  ;;  %v415_v13 = vld [vmem:[%s581_s3] sm:$0xff]   ;;  %v416_v14 = vld [vmem:[%s581_s3 + $0x8] sm:$0xff]   ;;  %v417_v15 = vld [vmem:[%s581_s3 + $0x10] sm:$0xff]  }
  0x16   :  { %v418_v16 = vld [vmem:[%s581_s3 + $0x18] sm:$0xff]   ;;  %v419_v17 = vld [vmem:[%s581_s3 + $0x20] sm:$0xff]   ;;  %v420_v18 = vld [vmem:[%s581_s3 + $0x28] sm:$0xff]  }
  0x17   :  { %361 = vmatmul.mubr.msk.bf16.vlgmr.msra.gmra.mrb[0].mxu0 %vm43_vm2, %v34_v4  ;;  %v318_v19 = vld [vmem:[%s582_s4] ss:$0 sm:$0xff]  ;;  %v421_v27 = vld [vmem:[%s581_s3 + $0x30] sm:$0xff]   ;;  %v422_v28 = vld [vmem:[%s581_s3 + $0x38] sm:$0xff]  }
  0x18   :  { %400 = vmatprep.mubr.msk.bf16.mxu0 %vm449_vm0, %v448_v0  ;;  %367 = vmatpush3.bf16.msra.mxu1 %v408_v6  ;;  %v320_v29 = vld [vmem:[%s582_s4 + $0x1] ss:$0 sm:$0xff]  ;;  %v329_v37 = vld [vmem:[%s582_s4 + $0x2] ss:$0 sm:$0xff] }
  0x19   :  { %368 = vmatprep.subr.bf16.mxu1 %v448_v0  ;;  %385 = vmatpush3.bf16.msra.mxu0 %v415_v13 }
  0x1a   :  { %386 = vmatprep.subr.bf16.mxu0 %v448_v0 }
  0x1c   :  { %369 = vmatpush3.bf16.msra.mxu1 %v409_v7 }
  0x1d   :  { %370 = vmatprep.subr.bf16.mxu1 %v448_v0  ;;  %387 = vmatpush3.bf16.msra.mxu0 %v416_v14 }
  0x1e   :  { %388 = vmatprep.subr.bf16.mxu0 %v448_v0 }
  0x20   :  { %371 = vmatpush3.bf16.msra.mxu1 %v410_v8 }
  0x21   :  { %372 = vmatprep.subr.bf16.mxu1 %v448_v0  ;;  %389 = vmatpush3.bf16.msra.mxu0 %v417_v15 }
  0x22   :  { %390 = vmatprep.subr.bf16.mxu0 %v448_v0 }
  0x24   :  { %373 = vmatpush3.bf16.msra.mxu1 %v411_v9 }
  0x25   :  { %374 = vmatprep.subr.bf16.mxu1 %v448_v0  ;;  %391 = vmatpush3.bf16.msra.mxu0 %v418_v16 }
  0x26   :  { %392 = vmatprep.subr.bf16.mxu0 %v448_v0 }
  0x28   :  { %375 = vmatpush3.bf16.msra.mxu1 %v412_v10 }
  0x29   :  { %376 = vmatprep.subr.bf16.mxu1 %v448_v0  ;;  %393 = vmatpush3.bf16.msra.mxu0 %v419_v17 }
  0x2a   :  { %394 = vmatprep.subr.bf16.mxu0 %v448_v0 }
  0x2c   :  { %377 = vmatpush3.bf16.msra.mxu1 %v413_v11 }
  0x2d   :  { %378 = vmatprep.subr.bf16.mxu1 %v448_v0  ;;  %395 = vmatpush3.bf16.msra.mxu0 %v420_v18 }
  0x2e   :  { %396 = vmatprep.subr.bf16.mxu0 %v448_v0 }
  0x30   :  { %379 = vmatpush3.bf16.msra.mxu1 %v414_v12 }
  0x31   :  { %397 = vmatpush3.bf16.msra.mxu0 %v421_v27 }
  0x32   :  { %398 = vmatprep.subr.bf16.mxu0 %v448_v0 }
  0x35   :  { %399 = vmatpush3.bf16.msra.mxu0 %v422_v28 }
  0xea   :  { %v85_v20 = vpop.f32.mrb[0].mxu0 }
  0xeb   :  { %v86_v21 = vadd.f32 %v318_v19, %v85_v20  ;;  %v362_v22 = vpop.f32.mrb[1].mxu0 }
  0xec   :  { %v88_v23 = vpop.f32.mrb[2].mxu0 }
  0xed   :  { %v91_v24 = vmax.f32 %v86_v21, 0.0  ;;  %v363_v25 = vpop.f32.mrb[3].mxu0 }
  0xef   :  { %v92_v26 = vpack.c.bf16 %v91_v24, %v91_v24 }
  0xf1   :  { %381 = vmatmul.mubr.bf16.vlgmr.msra.gmra.mrb[0].mxu1 %v92_v26 }
 0x1c4   :  { %v195_v30 = vpop.f32.mrb[0].mxu1 }
 0x1c5   :  { %v196_v31 = vadd.f32 %v320_v29, %v195_v30  ;;  %v382_v32 = vpop.f32.mrb[1].mxu1 }
 0x1c6   :  { %v198_v33 = vpop.f32.mrb[2].mxu1 }
 0x1c7   :  { %v201_v34 = vmax.f32 %v196_v31, 0.0  ;;  %v383_v35 = vpop.f32.mrb[3].mxu1 }
 0x1c9   :  { %v202_v36 = vpack.c.bf16 %v201_v34, %v201_v34 }
 0x1cb   :  { %401 = vmatmul.mubr.bf16.vlgmr.msra.gmra.mrb[4].mxu0 %v202_v36 }
 0x29e   :  { %v305_v38 = vpop.f32.mrb[4].mxu0 }
 0x29f   :  { %v306_v39 = vadd.f32 %v329_v37, %v305_v38  ;;  %v402_v40 = vpop.f32.mrb[5].mxu0 }
 0x2a0   :  { %v308_v41 = vpop.f32.mrb[6].mxu0 }
 0x2a1   :  { %312 = vst.msk [vmem:[%s583_s5] sm:$0xff] %vm311_vm3, %v306_v39  ;;  %v403_v42 = vpop.f32.mrb[7].mxu0 }
 0x2a2   :  { %317 = vsyncpa [#allocation3], 1 }

</bundles_post_ra>
